<compile_context>
chip_gen: v7x
topology: tpu7x:2x2x1
jax: 0.10.0
libtpu: 0.0.40
codegen_flags: <defaults>
</compile_context>

<pallas_src>
import jax
import jax.numpy as jnp
from jax.experimental import pallas as pl
from jax.experimental.pallas import tpu as pltpu


# ----------------------------------------------------------------------------- kernel

def _make_kernel(num_layers, tn):
    """Kernel for one (group g, N-tile n) grid point.

    Refs (in order): x, qw, then per-layer params interleaved (W0, b0, W1, b1, ...),
    then the output ref (resident across the N axis) and the norm accumulator scratch.
    """

    def kernel(x_ref, qw_ref, *refs):
        out_ref, acc_ref = refs[-2], refs[-1]
        prefs = refs[:-2]                      # (W0, b0, W1, b1, ..., W_{L-1}, b_{L-1})

        n = pl.program_id(1)
        last = pl.num_programs(1) - 1

        x = x_ref[...]                          # [1, tn]
        # Layer 0 (in_features == 1): one VPU broadcast for all nets in the group.
        h = prefs[0][...] * x + prefs[1][...]   # [Kg*h1, tn]

        # Hidden + output layers: one block-diagonal MXU matmul per layer.
        for li in range(1, num_layers):
            W = prefs[2 * li][...]              # [Kg*n_out, Kg*n_in]
            b = prefs[2 * li + 1][...]          # [Kg*n_out, 1]
            h = jnp.dot(W, jnp.tanh(h), preferred_element_type=jnp.float32) + b

        # Accumulate the quadrature-weighted squared norm across N tiles.
        part = jnp.sum(qw_ref[...] * h * h, axis=-1, keepdims=True)   # [Kg*p, 1]

        @pl.when(n == 0)
        def _():
            acc_ref[...] = jnp.zeros_like(acc_ref)

        acc_ref[...] += part

        # Store the un-normalized tile into the resident output block.
        col = pl.multiple_of(n * tn, 128)
        out_ref[:, pl.ds(col, tn)] = h

        # Finalize: rescale the whole resident block (rsqrt -> EUP slot).
        @pl.when(n == last)
        def _():
            out_ref[...] = out_ref[...] * jax.lax.rsqrt(acc_ref[...])

    return kernel


# ------------------------------------------------------------------- host-side packing

def _group_block_diag(W, G):
    """[K, n_out, n_in] -> per-group block-diagonal [G, Kg*n_out, Kg*n_in]."""
    K, n_out, n_in = W.shape
    Kg = K // G
    Wg = W.reshape(G, Kg, n_out, n_in)
    eye = jnp.eye(Kg, dtype=W.dtype)
    return jnp.einsum("gkab,kl->gkalb", Wg, eye).reshape(G, Kg * n_out, Kg * n_in)


def choose_num_groups(K, widths, mxu_dim=128):
    """Smallest number of groups G (dividing K) with Kg*width <= mxu_dim; >=2 if possible."""
    divisors = [g for g in range(1, K + 1) if K % g == 0]
    max_w = max(widths) if widths else 1
    G = K
    for g in divisors:
        if (K // g) * max_w <= mxu_dim:
            G = g
            break
    if G == 1 and K >= 2:
        # Use >=2 groups so the leading 'parallel' grid axis can shard across
        # v7x's two TensorCores (no-op cost on single-TC v5e/v6e).
        G = min(g for g in divisors if g >= 2)
    return G


def pack_multi_tnn_params(weights, biases, k, dim, mxu_dim=128):
    """One-time packing of Multi_TNN parameters into per-group block-diag form.

    Call once at init (or per optimizer step); feed the cached result to every
    multi_tnn_forward call.  weights[li]: [K, n_out, n_in]; biases[li]: [K, n_out, 1] or None.
    """
    K = k * dim
    num_layers = len(weights)
    widths = [w.shape[1] for w in weights] + [w.shape[2] for w in weights[1:]]
    G = choose_num_groups(K, widths, mxu_dim)
    Kg = K // G
    p = weights[-1].shape[1]
    h1 = weights[0].shape[1]

    def _bias(li, n_out):
        b = biases[li]
        if b is None:
            b = jnp.zeros((K, n_out, 1), dtype=jnp.float32)
        return b

    packed = []
    # Layer 0 (in_features == 1): weight and bias as separate [G, Kg*h1, 1] refs.
    packed.append(weights[0].reshape(G, Kg * h1, 1).astype(jnp.float32))
    packed.append(_bias(0, h1).reshape(G, Kg * h1, 1).astype(jnp.float32))
    # Layers 1..L-1: per-group block-diagonal weight + separate bias ref.
    for li in range(1, num_layers):
        n_out = weights[li].shape[1]
        packed.append(_group_block_diag(weights[li].astype(jnp.float32), G))
        packed.append(_bias(li, n_out).reshape(G, Kg * n_out, 1).astype(jnp.float32))

    meta = dict(G=G, Kg=Kg, p=p, num_layers=num_layers)
    return packed, meta


# --------------------------------------------------------------------------- forward

def multi_tnn_forward(w, x, packed, meta, k, dim, *, n_tile_cap=1024):
    """Pallas implementation of Multi_TNN.forward(w, x, need_grad=0, normed=True)."""
    G, Kg, p, num_layers = meta["G"], meta["Kg"], meta["p"], meta["num_layers"]
    N = x.shape[0]
    assert N % 128 == 0, "N (quadrature points) must be a multiple of 128 lanes"

    # Largest N-tile that divides N, is a multiple of 128, and is <= n_tile_cap.
    tn = 128
    t = 128
    while t <= min(N, n_tile_cap):
        if N % t == 0:
            tn = t
        t += 128
    nt = N // tn

    x2 = x.reshape(1, N).astype(jnp.float32)
    w2 = w.reshape(1, N).astype(jnp.float32)

    in_specs = [
        pl.BlockSpec((1, tn), lambda g, n: (0, n)),   # quadrature points tile
        pl.BlockSpec((1, tn), lambda g, n: (0, n)),   # quadrature weights tile
    ]
    for arr in packed:                                # per-group params (constant over n)
        rows, cols = arr.shape[1], arr.shape[2]
        in_specs.append(pl.BlockSpec((None, rows, cols), lambda g, n: (g, 0, 0)))

    # Output block is resident across the N axis (rescaled at the last N step).
    out_spec = pl.BlockSpec((None, Kg * p, N), lambda g, n: (g, 0, 0))

    # Explicit VMEM budget (v7x: 64 MiB physical / 32 MiB default scoped).
    resident = Kg * p * N * 4
    inputs = 2 * 2 * tn * 4
    params = 2 * sum((int(a.size) // G) * 4 for a in packed)
    scratch = Kg * p * 4
    vmem_bytes = int(min(max(4 * (resident + inputs + params + scratch), 4 << 20), 32 << 20))

    out = pl.pallas_call(
        _make_kernel(num_layers, tn),
        out_shape=jax.ShapeDtypeStruct((G, Kg * p, N), jnp.float32),
        grid=(G, nt),
        in_specs=in_specs,
        out_specs=out_spec,
        scratch_shapes=[pltpu.VMEM((Kg * p, 1), jnp.float32)],
        compiler_params=pltpu.CompilerParams(
            dimension_semantics=("parallel", "arbitrary"),
            vmem_limit_bytes=vmem_bytes,
        ),
    )(x2, w2, *packed)
    # Groups are contiguous slices of the K nets, so this reshape is exact.
    return out.reshape(k, dim, p, N)


# ------------------------------------------------------------------------ test harness

def _orthogonal_init(key, K, n_out, n_in):
    """Deterministic per-slice orthogonal init (mirrors nn.init.orthogonal_)."""
    rows, cols = max(n_out, n_in), min(n_out, n_in)
    a = jax.random.normal(key, (K, rows, cols), dtype=jnp.float32)
    q, r = jnp.linalg.qr(a)
    d = jnp.sign(jnp.diagonal(r, axis1=-2, axis2=-1))
    q = q * d[:, None, :]
    if n_out < n_in:
        q = jnp.swapaxes(q, -2, -1)
    return q  # [K, n_out, n_in]


def _ref_forward(w, x, weights, biases, k, dim):
    """Pure-JAX reference mirroring the PyTorch forward."""
    h = weights[0] * x[None, None, :] + biases[0]          # [K, h1, N]
    for li in range(1, len(weights)):
        h = jnp.tanh(h)
        h = jnp.einsum("koi,kin->kon", weights[li], h) + biases[li]
    nrm = jnp.sqrt(jnp.sum(w[None, None, :] * h * h, axis=2, keepdims=True))
    phi = h / nrm
    return phi.reshape(k, dim, -1, x.shape[0])


if __name__ == "__main__":
    # Small, forward-consistent configuration.
    k, dim = 2, 3                 # K = 6 FNNs
    size = [1, 16, 16, 8]         # each FNN: 1 -> 16 -> 16 -> p=8, all with bias
    N = 128                       # number of quadrature points
    K = k * dim

    key = jax.random.PRNGKey(0)
    keys = jax.random.split(key, len(size) + 1)

    # Parameters: orthogonal weights, zero biases (as in Multi_TNN.__initialize).
    weights, biases = [], []
    for i in range(1, len(size)):
        n_out, n_in = abs(size[i]), abs(size[i - 1])
        weights.append(_orthogonal_init(keys[i], K, n_out, n_in))
        biases.append(jnp.zeros((K, n_out, 1), dtype=jnp.float32))

    # Quadrature points in [0, 1], positive weights summing to 1.
    x = jax.random.uniform(keys[-1], (N,), dtype=jnp.float32)
    w = jnp.full((N,), 1.0 / N, dtype=jnp.float32)

    # Pack once (block-diag construction hoisted out of the per-forward path).
    packed, meta = pack_multi_tnn_params(weights, biases, k, dim)
    packed = jax.block_until_ready(packed)

    phi = multi_tnn_forward(w, x, packed, meta, k, dim)
    phi = jax.block_until_ready(phi)

    phi_ref = _ref_forward(w, x, weights, biases, k, dim)
    assert phi.shape == (k, dim, size[-1], N), phi.shape
    assert jnp.allclose(phi, phi_ref, atol=1e-4, rtol=1e-4), (
        float(jnp.max(jnp.abs(phi - phi_ref)))
    )
    print("KERNEL_OK")
</pallas_src>

<mosaic_0001>
module attributes {stable_mosaic.version = 11 : i64} {
  func.func @kernel(%arg0: i32, %arg1: i32, %arg2: memref<1x128xf32, #tpu.memory_space<vmem>>, %arg3: memref<1x128xf32, #tpu.memory_space<vmem>>, %arg4: memref<1x48x1xf32, #tpu.memory_space<vmem>>, %arg5: memref<1x48x1xf32, #tpu.memory_space<vmem>>, %arg6: memref<1x48x48xf32, #tpu.memory_space<vmem>>, %arg7: memref<1x48x1xf32, #tpu.memory_space<vmem>>, %arg8: memref<1x24x48xf32, #tpu.memory_space<vmem>>, %arg9: memref<1x24x1xf32, #tpu.memory_space<vmem>>, %arg10: memref<1x24x128xf32, #tpu.memory_space<vmem>>, %arg11: memref<24x1xf32, #tpu.memory_space<vmem>>) attributes {dimension_semantics = [#tpu.dimension_semantics<parallel>, #tpu.dimension_semantics<arbitrary>], iteration_bounds = array<i64: 2, 1>, scalar_prefetch = 0 : i64, scratch_operands = 1 : i64, tpu.core_type = #tpu.core_type<tc>, window_params = [{transform_indices = @transform_0, window_bounds = array<i64: 1, 128>}, {transform_indices = @transform_1, window_bounds = array<i64: 1, 128>}, {transform_indices = @transform_2, window_bounds = array<i64: 1, 48, 1>}, {transform_indices = @transform_3, window_bounds = array<i64: 1, 48, 1>}, {transform_indices = @transform_4, window_bounds = array<i64: 1, 48, 48>}, {transform_indices = @transform_5, window_bounds = array<i64: 1, 48, 1>}, {transform_indices = @transform_6, window_bounds = array<i64: 1, 24, 48>}, {transform_indices = @transform_7, window_bounds = array<i64: 1, 24, 1>}, {transform_indices = @transform_8, window_bounds = array<i64: 1, 24, 128>}]} {
    %c0 = arith.constant 0 : index
    %c0_0 = arith.constant 0 : index
    %0 = vector.load %arg2[%c0, %c0_0] : memref<1x128xf32, #tpu.memory_space<vmem>>, vector<1x128xf32>
    %c0_1 = arith.constant 0 : index
    %c0_2 = arith.constant 0 : index
    %c0_3 = arith.constant 0 : index
    %1 = vector.load %arg4[%c0_1, %c0_2, %c0_3] : memref<1x48x1xf32, #tpu.memory_space<vmem>>, vector<1x48x1xf32>
    %2 = vector.shape_cast %1 : vector<1x48x1xf32> to vector<48x1xf32>
    %3 = vector.broadcast %2 : vector<48x1xf32> to vector<48x128xf32>
    %4 = vector.broadcast %0 : vector<1x128xf32> to vector<48x128xf32>
    %5 = arith.mulf %3, %4 : vector<48x128xf32>
    %c0_4 = arith.constant 0 : index
    %c0_5 = arith.constant 0 : index
    %c0_6 = arith.constant 0 : index
    %6 = vector.load %arg5[%c0_4, %c0_5, %c0_6] : memref<1x48x1xf32, #tpu.memory_space<vmem>>, vector<1x48x1xf32>
    %7 = vector.shape_cast %6 : vector<1x48x1xf32> to vector<48x1xf32>
    %8 = vector.broadcast %7 : vector<48x1xf32> to vector<48x128xf32>
    %9 = arith.addf %5, %8 : vector<48x128xf32>
    %c0_7 = arith.constant 0 : index
    %c0_8 = arith.constant 0 : index
    %c0_9 = arith.constant 0 : index
    %10 = vector.load %arg6[%c0_7, %c0_8, %c0_9] : memref<1x48x48xf32, #tpu.memory_space<vmem>>, vector<1x48x48xf32>
    %11 = vector.shape_cast %10 : vector<1x48x48xf32> to vector<48x48xf32>
    %c0_10 = arith.constant 0 : index
    %c0_11 = arith.constant 0 : index
    %c0_12 = arith.constant 0 : index
    %12 = vector.load %arg7[%c0_10, %c0_11, %c0_12] : memref<1x48x1xf32, #tpu.memory_space<vmem>>, vector<1x48x1xf32>
    %13 = vector.shape_cast %12 : vector<1x48x1xf32> to vector<48x1xf32>
    %14 = math.tanh %9 : vector<48x128xf32>
    %cst = arith.constant dense<0.000000e+00> : vector<48x128xf32>
    %15 = tpu.matmul %11, %14, %cst {dimension_numbers = #tpu.dot_dimension_numbers<[1], [0], [0], [1], [0, 0, 1, 1], [], []>} : vector<48x48xf32>, vector<48x128xf32>, vector<48x128xf32> -> vector<48x128xf32>
    %16 = vector.broadcast %13 : vector<48x1xf32> to vector<48x128xf32>
    %17 = arith.addf %15, %16 : vector<48x128xf32>
    %c0_13 = arith.constant 0 : index
    %c0_14 = arith.constant 0 : index
    %c0_15 = arith.constant 0 : index
    %18 = vector.load %arg8[%c0_13, %c0_14, %c0_15] : memref<1x24x48xf32, #tpu.memory_space<vmem>>, vector<1x24x48xf32>
    %19 = vector.shape_cast %18 : vector<1x24x48xf32> to vector<24x48xf32>
    %c0_16 = arith.constant 0 : index
    %c0_17 = arith.constant 0 : index
    %c0_18 = arith.constant 0 : index
    %20 = vector.load %arg9[%c0_16, %c0_17, %c0_18] : memref<1x24x1xf32, #tpu.memory_space<vmem>>, vector<1x24x1xf32>
    %21 = vector.shape_cast %20 : vector<1x24x1xf32> to vector<24x1xf32>
    %22 = math.tanh %17 : vector<48x128xf32>
    %cst_19 = arith.constant dense<0.000000e+00> : vector<24x128xf32>
    %23 = tpu.matmul %19, %22, %cst_19 {dimension_numbers = #tpu.dot_dimension_numbers<[1], [0], [0], [1], [0, 0, 1, 1], [], []>} : vector<24x48xf32>, vector<48x128xf32>, vector<24x128xf32> -> vector<24x128xf32>
    %24 = vector.broadcast %21 : vector<24x1xf32> to vector<24x128xf32>
    %25 = arith.addf %23, %24 : vector<24x128xf32>
    %c0_20 = arith.constant 0 : index
    %c0_21 = arith.constant 0 : index
    %26 = vector.load %arg3[%c0_20, %c0_21] : memref<1x128xf32, #tpu.memory_space<vmem>>, vector<1x128xf32>
    %27 = vector.broadcast %26 : vector<1x128xf32> to vector<24x128xf32>
    %28 = arith.mulf %27, %25 : vector<24x128xf32>
    %29 = arith.mulf %28, %25 : vector<24x128xf32>
    %cst_22 = arith.constant dense<0.000000e+00> : vector<24xf32>
    %30 = vector.multi_reduction <add>, %29, %cst_22 [1] : vector<24x128xf32> to vector<24xf32>
    %31 = vector.shape_cast %30 : vector<24xf32> to vector<24x1xf32>
    %c0_i32 = arith.constant 0 : i32
    %32 = arith.cmpi eq, %arg1, %c0_i32 : i32
    %33 = arith.extui %32 : i1 to i32
    %c0_i32_23 = arith.constant 0 : i32
    %34 = arith.cmpi ne, %33, %c0_i32_23 : i32
    scf.if %34 {
      %cst_32 = arith.constant 0.000000e+00 : f32
      %47 = vector.broadcast %cst_32 : f32 to vector<24x1xf32>
      %c0_33 = arith.constant 0 : index
      %c0_34 = arith.constant 0 : index
      %48 = vector.load %arg11[%c0_33, %c0_34] : memref<24x1xf32, #tpu.memory_space<vmem>>, vector<24x1xf32>
      tpu.vector_store %arg11[%c0_33, %c0_34], %47 {strides = array<i32>} : memref<24x1xf32, #tpu.memory_space<vmem>>, vector<24x1xf32>,
    } else {
    }
    %c0_24 = arith.constant 0 : index
    %c0_25 = arith.constant 0 : index
    %35 = vector.load %arg11[%c0_24, %c0_25] : memref<24x1xf32, #tpu.memory_space<vmem>>, vector<24x1xf32>
    %36 = arith.addf %35, %31 : vector<24x1xf32>
    %c0_26 = arith.constant 0 : index
    %c0_27 = arith.constant 0 : index
    %37 = vector.load %arg11[%c0_26, %c0_27] : memref<24x1xf32, #tpu.memory_space<vmem>>, vector<24x1xf32>
    tpu.vector_store %arg11[%c0_26, %c0_27], %36 {strides = array<i32>} : memref<24x1xf32, #tpu.memory_space<vmem>>, vector<24x1xf32>,
    %c128_i32 = arith.constant 128 : i32
    %38 = arith.muli %arg1, %c128_i32 : i32
    %39 = tpu.assume_multiple %38, 128 : i32
    %c0_28 = arith.constant 0 : index
    %c0_29 = arith.constant 0 : index
    %40 = arith.index_cast %39 : i32 to index
    %41 = vector.load %arg10[%c0_28, %c0_29, %40] : memref<1x24x128xf32, #tpu.memory_space<vmem>>, vector<1x24x128xf32>
    %42 = vector.shape_cast %41 : vector<1x24x128xf32> to vector<24x128xf32>
    %43 = vector.shape_cast %25 : vector<24x128xf32> to vector<1x24x128xf32>
    tpu.vector_store %arg10[%c0_28, %c0_29, %40], %43 {strides = array<i32>} : memref<1x24x128xf32, #tpu.memory_space<vmem>>, vector<1x24x128xf32>,
    %c0_i32_30 = arith.constant 0 : i32
    %44 = arith.cmpi eq, %arg1, %c0_i32_30 : i32
    %45 = arith.extui %44 : i1 to i32
    %c0_i32_31 = arith.constant 0 : i32
    %46 = arith.cmpi ne, %45, %c0_i32_31 : i32
    scf.if %46 {
      %c0_32 = arith.constant 0 : index
      %c0_33 = arith.constant 0 : index
      %c0_34 = arith.constant 0 : index
      %47 = vector.load %arg10[%c0_32, %c0_33, %c0_34] : memref<1x24x128xf32, #tpu.memory_space<vmem>>, vector<1x24x128xf32>
      %48 = vector.shape_cast %47 : vector<1x24x128xf32> to vector<24x128xf32>
      %c0_35 = arith.constant 0 : index
      %c0_36 = arith.constant 0 : index
      %49 = vector.load %arg11[%c0_35, %c0_36] : memref<24x1xf32, #tpu.memory_space<vmem>>, vector<24x1xf32>
      %50 = math.rsqrt %49 : vector<24x1xf32>
      %51 = vector.broadcast %50 : vector<24x1xf32> to vector<24x128xf32>
      %52 = arith.mulf %48, %51 : vector<24x128xf32>
      %c0_37 = arith.constant 0 : index
      %c0_38 = arith.constant 0 : index
      %c0_39 = arith.constant 0 : index
      %53 = vector.load %arg10[%c0_37, %c0_38, %c0_39] : memref<1x24x128xf32, #tpu.memory_space<vmem>>, vector<1x24x128xf32>
      %54 = vector.shape_cast %53 : vector<1x24x128xf32> to vector<24x128xf32>
      %55 = vector.shape_cast %52 : vector<24x128xf32> to vector<1x24x128xf32>
      tpu.vector_store %arg10[%c0_37, %c0_38, %c0_39], %55 {strides = array<i32>} : memref<1x24x128xf32, #tpu.memory_space<vmem>>, vector<1x24x128xf32>,
    } else {
    }
    return
  }
  func.func @transform_0(%arg0: i32, %arg1: i32) -> (i32, i32) {
    %c0_i32 = arith.constant 0 : i32
    %c0_i32_0 = arith.constant 0 : i32
    return %c0_i32, %arg1 : i32, i32
  }
  func.func @transform_1(%arg0: i32, %arg1: i32) -> (i32, i32) {
    %c0_i32 = arith.constant 0 : i32
    %c0_i32_0 = arith.constant 0 : i32
    return %c0_i32, %arg1 : i32, i32
  }
  func.func @transform_2(%arg0: i32, %arg1: i32) -> (i32, i32, i32) {
    %c0_i32 = arith.constant 0 : i32
    %c0_i32_0 = arith.constant 0 : i32
    %c0_i32_1 = arith.constant 0 : i32
    return %arg0, %c0_i32, %c0_i32_0 : i32, i32, i32
  }
  func.func @transform_3(%arg0: i32, %arg1: i32) -> (i32, i32, i32) {
    %c0_i32 = arith.constant 0 : i32
    %c0_i32_0 = arith.constant 0 : i32
    %c0_i32_1 = arith.constant 0 : i32
    return %arg0, %c0_i32, %c0_i32_0 : i32, i32, i32
  }
  func.func @transform_4(%arg0: i32, %arg1: i32) -> (i32, i32, i32) {
    %c0_i32 = arith.constant 0 : i32
    %c0_i32_0 = arith.constant 0 : i32
    %c0_i32_1 = arith.constant 0 : i32
    return %arg0, %c0_i32, %c0_i32_0 : i32, i32, i32
  }
  func.func @transform_5(%arg0: i32, %arg1: i32) -> (i32, i32, i32) {
    %c0_i32 = arith.constant 0 : i32
    %c0_i32_0 = arith.constant 0 : i32
    %c0_i32_1 = arith.constant 0 : i32
    return %arg0, %c0_i32, %c0_i32_0 : i32, i32, i32
  }
  func.func @transform_6(%arg0: i32, %arg1: i32) -> (i32, i32, i32) {
    %c0_i32 = arith.constant 0 : i32
    %c0_i32_0 = arith.constant 0 : i32
    %c0_i32_1 = arith.constant 0 : i32
    return %arg0, %c0_i32, %c0_i32_0 : i32, i32, i32
  }
  func.func @transform_7(%arg0: i32, %arg1: i32) -> (i32, i32, i32) {
    %c0_i32 = arith.constant 0 : i32
    %c0_i32_0 = arith.constant 0 : i32
    %c0_i32_1 = arith.constant 0 : i32
    return %arg0, %c0_i32, %c0_i32_0 : i32, i32, i32
  }
  func.func @transform_8(%arg0: i32, %arg1: i32) -> (i32, i32, i32) {
    %c0_i32 = arith.constant 0 : i32
    %c0_i32_0 = arith.constant 0 : i32
    %c0_i32_1 = arith.constant 0 : i32
    return %arg0, %c0_i32, %c0_i32_0 : i32, i32, i32
  }
}

</mosaic_0001>

<bundles_post_ra>
// kernel: tpu_custom_call.1
= control target key start
LH: loop header
LB: loop body
LE: loop exit
PB: predicated region body
PF: predicated region fallthrough
CT: control target
= control target key end

     0   :  { %13 = vsyncpa [#allocation4], 0  ;;  %s1575_s0 = inlined_call_operand.vmem [shape: f32[1,128], index: 0, kind: input, shape index: {}]   ;;  %s1576_s1 = inlined_call_operand.vmem [shape: f32[1,128], index: 1, kind: input, shape index: {}]   ;;  %s1577_s2 = inlined_call_operand.vmem [shape: f32[2,48,1], index: 2, kind: input, shape index: {}]   ;;  %s1578_s3 = inlined_call_operand.vmem [shape: f32[2,48,1], index: 3, kind: input, shape index: {}]   ;;  %s1579_s4 = inlined_call_operand.vmem [shape: f32[2,48,48], index: 4, kind: input, shape index: {}]   ;;  %s1580_s5 = inlined_call_operand.vmem [shape: f32[2,48,1], index: 5, kind: input, shape index: {}]   ;;  %s1581_s6 = inlined_call_operand.vmem [shape: f32[2,24,48], index: 6, kind: input, shape index: {}]   ;;  %s1582_s7 = inlined_call_operand.vmem [shape: f32[2,24,1], index: 7, kind: input, shape index: {}]   ;;  %s1583_s8 = inlined_call_operand.hbm [shape: f32[2,24,128], index: 8, kind: output, shape index: {}]  }
   0x1   :  { %15 = vsyncpa [#allocation4 + $0x1], 0  ;;  %s1399_s27 = smov 0   ;;  %s1401_s28 = smov 0  }
   0x2   :  { %s1403_s29 = smov 0   ;;  %s1405_s30 = smov 0  }
   0x3   :  { %s1407_s9 = smov 0   ;;  %s1409_s10 = smov 0  }
   0x4 LB: > { %s1059_s11 = sadd.s32 4294967295, %s1345_s10   ;;  %s1060_s12 = sadd.s32 4294967294, %s1345_s10   ;;  %s1345_s10 = sphi %s1409_s10, %s21_s10   ;;  %s1341_s9 = sphi %s1407_s9, %s1590_s9   ;;  %s1337_s30 = sphi %s1405_s30, %s1589_s30   ;;  %s1333_s29 = sphi %s1403_s29, %s1588_s29   ;;  %s1329_s28 = sphi %s1401_s28, %s1587_s28   ;;  %s1325_s27 = sphi %s1399_s27, %s1586_s27  }
   0x5   : > { %s33_s13 = sadd.s32 1, %s1341_s9  ;;  %s248_s14 = sadd.s32 1, %s1333_s29 }
   0x6   : > { %p35_p0 = scmp.ge.s32.totalorder %s33_s13, 2  ;;  %p258_p1 = scmp.ne.s32.totalorder %s1333_s29, %s1329_s28 }
   0x7   : > { %p259_p2 = scmp.eq.s32.totalorder %s1059_s11, 1  ;;  %p264_p3 = scmp.ne.s32.totalorder %s1329_s28, %s1325_s27 }
   0x8   : > { %s1592_s13 = smov (%p35_p0, %s33_s13), 0  ;;  %p265_p5 = scmp.eq.s32.totalorder %s1060_s12, 1 }
   0x9   : > { %p1439_p4 = por %p259_p2, %p258_p1  ;;  %s245_s16 = ssub.s32 %s1341_s9, %s1592_s13 }
   0xa   : > { %p1065_p6 = scmp.ge.s32.totalorder %s1345_s10, 1  ;;  %p246_p7 = scmp.eq.s32.totalorder %s245_s16, 0 }
   0xb   : > { %p1446_p8 = por %p265_p5, %p264_p3  ;;  %p343_p9 = scmp.lt.s32.totalorder %s1345_s10, 3 }
   0xc   : > { %s1452_s18 = scalar_select %p246_p7, %s1333_s29, %s248_s14  }
   0xd   : > { %p344_p10 = pnand %p1065_p6, %p343_p9 }
   0xe   : > { %p414_p11 = scmp.lt.s32.totalorder (!%p344_p10), %s1337_s30, 1  ;;  %v1347_v0 = vmov (!%p344_p10), 0   ;;  %vm583_vm0 = vcmask (!%p344_p10), 392192   ;;  %v1072_v23 = vld [vmem:[%s1575_s0] ss:$0 sm:$0xff] (!%p344_p10)  ;;  %v1348_v62 = vmov (!%p344_p10), 0.0|0.0  }
   0xf   : > { %347 = sbr.rel (%p344_p10) target bundleno = 969 (0x3c9), region = 52  ;;  %1236 = vset.pattern.permute.xlu1 (!%p344_p10), %v1347_v0  ;;  %1235 = vset.pattern.permute.xlu0 (!%p344_p10), %v1347_v0  ;;  %vm1349_vm1 = vmmov (!%p344_p10), 0   ;;  %v1350_v63 = vmov (!%p344_p10), 0.0   ;;  %vm836_vm2 = vcmask (!%p344_p10), 7168   ;;  %s405_s22 = sand.u32 (!%p344_p10), 1, %s1329_s28  }
  0x10   : > { %1161 = vmatprep.subr.bf16.mxu1 (!%p344_p10), %v1348_v62  ;;  %1140 = vmatprep.mubr.msk.f32.mxu1 (!%p344_p10), %vm1349_vm1, %v1350_v63  ;;  %837 = vst.msk [vmem:[#allocation2] sm:$0xff] (!%p344_p10), %vm836_vm2, %v1350_v63  ;;  %838 = vst.msk [vmem:[#allocation2 + $0x8] sm:$0xff] (!%p344_p10), %vm836_vm2, %v1350_v63  ;;  %s1173_s25 = smul.u32 (!%p344_p10), 384, %s1337_s30 }
  0x11   : > { %839 = vst.msk [vmem:[#allocation2 + $0x10] sm:$0xff] (!%p344_p10), %vm836_vm2, %v1350_v63 }
  0x16   : > { %s1456_s19 = scalar_select %p414_p11, %s1337_s30, 1 }
  0x17   : > { %s1351_s30 = smov [#allocation3]  }
  0x18   : > { %s1459_s20 = smul.u32 48, %s1456_s19 }
  0x19   : > { %s1172_s16 = smul.u32 24, %s1456_s19  ;;  %s1271_s19 = sshll.u32 %s1351_s30, 4  ;;  %s1272_s19 = int_to_ptr.vmem [resolvable:$false] %s1271_s19 }
  0x1a   : > { %s423_s23 = scalar_lea.vmem %s1578_s3, %s1459_s20  ;;  %s418_s26 = scalar_lea.vmem %s1577_s2, %s1459_s20 }
  0x1b   : > { %v493_v1 = vld [vmem:[%s423_s23] sm:$0xff]  ;;  %v494_v3 = vld [vmem:[%s423_s23 + $0x8] sm:$0xff]  ;;  %v448_v5 = vld [vmem:[%s418_s26 + $0x18] sm:$0xff]  ;;  %s433_s14 = scalar_lea.vmem %s1580_s5, %s1459_s20  ;;  %s438_s21 = scalar_lea.vmem %s1581_s6, %s1172_s16 }
  0x1c   : > { %v445_v2 = vld [vmem:[%s418_s26] sm:$0xff]  ;;  %501 = vperm.xlu1 %1236, %v493_v1   ;;  %v446_v4 = vld [vmem:[%s418_s26 + $0x8] sm:$0xff]  ;;  %v447_v6 = vld [vmem:[%s418_s26 + $0x10] sm:$0xff] }
  0x1d   : > { %453 = vperm.xlu0 %1235, %v445_v2   ;;  %v496_v7 = vld [vmem:[%s423_s23 + $0x18] sm:$0xff]  ;;  %v495_v8 = vld [vmem:[%s423_s23 + $0x10] sm:$0xff]  ;;  %v450_v9 = vld [vmem:[%s418_s26 + $0x28] sm:$0xff] }
  0x1e   : > { %v449_v10 = vld [vmem:[%s418_s26 + $0x20] sm:$0xff]  ;;  %v498_v11 = vld [vmem:[%s423_s23 + $0x28] sm:$0xff]  ;;  %v544_v15 = vld [vmem:[%s433_s14 + $0x18] sm:$0xff]  ;;  %s1483_s26 = scalar_lea.vmem %s1579_s4, %s1459_s20  ;;  %s1525_s20 = scalar_lea.hbm %s1583_s8, %s1173_s25 }
  0x1f   : > { %v497_v12 = vld [vmem:[%s423_s23 + $0x20] sm:$0xff]  ;;  %v542_v13 = vld [vmem:[%s433_s14 + $0x8] sm:$0xff]  ;;  %v543_v16 = vld [vmem:[%s433_s14 + $0x10] sm:$0xff]  ;;  %s443_s23 = scalar_lea.vmem %s1582_s7, %s1172_s16  ;;  %s1273_s16 = scalar_lea.vmem %s1272_s19, 768 }
  0x20   : > { %506 = vperm.xlu1 %1236, %v494_v3   ;;  %v541_v14 = vld [vmem:[%s433_s14] sm:$0xff]  ;;  %v546_v17 = vld [vmem:[%s433_s14 + $0x28] sm:$0xff]  ;;  %v702_v21 = vld [vmem:[%s443_s23 + $0x10] sm:$0xff] }
  0x21   : > { %458 = vperm.xlu0 %1235, %v446_v4   ;;  %v545_v18 = vld [vmem:[%s433_s14 + $0x20] sm:$0xff]  ;;  %v701_v19 = vld [vmem:[%s443_s23 + $0x8] sm:$0xff]  ;;  %v537_v58 = vld [vmem:[%s1483_s26 + $0x10] sm:$0xff]  ;;  %s1529_s14 = scalar_lea.sflag [#allocation4], %s405_s22 }
  0x22   : > { %v700_v20 = vld [vmem:[%s443_s23] sm:$0xff]  ;;  %v536_v57 = vld [vmem:[%s1483_s26 + $0x8] sm:$0xff]  ;;  %v538_v59 = vld [vmem:[%s1483_s26 + $0x18] sm:$0xff]  ;;  %s1170_s23 = smul.u32 24, %s405_s22 }
  0x23   : > { %v535_v22 = vld [vmem:[%s1483_s26] sm:$0xff]  ;;  %v540_v61 = vld [vmem:[%s1483_s26 + $0x28] sm:$0xff] }
  0x24   : > { %468 = vperm.xlu1 %1236, %v448_v5   ;;  %1119 = vmatprep.mubr.msk.f32.mxu0 %vm583_vm0, %v535_v22  ;;  %v539_v60 = vld [vmem:[%s1483_s26 + $0x20] sm:$0xff]  ;;  %s407_s24 = scalar_lea.vmem [#allocation3], %s1170_s23 }
  0x25   : > { %463 = vperm.xlu0 %1235, %v447_v6   ;;  %s904_s26 = sshll.u32 %s407_s24, 4  ;;  %s1527_s26 = int_to_ptr.vmem [resolvable:$true] %s904_s26 }
  0x26   : > { %p1274_p1 = scmp.lt.s32.totalorder %s1527_s26, %s1272_s19 }
  0x28   : > { %516 = vperm.xlu1 %1236, %v496_v7  }
  0x29   : > { %511 = vperm.xlu0 %1235, %v495_v8  }
  0x2c   : > { %478 = vperm.xlu1 %1236, %v450_v9  }
  0x2d   : > { %473 = vperm.xlu0 %1235, %v449_v10  }
  0x30   : > { %526 = vperm.xlu1 %1236, %v498_v11  }
  0x31   : > { %521 = vperm.xlu0 %1235, %v497_v12  }
  0x34   : > { %560 = vperm.xlu1 %1236, %v542_v13  }
  0x35   : > { %555 = vperm.xlu0 %1235, %v541_v14  }
  0x38   : > { %570 = vperm.xlu1 %1236, %v544_v15  }
  0x39   : > { %565 = vperm.xlu0 %1235, %v543_v16  }
  0x3c   : > { %580 = vperm.xlu1 %1236, %v546_v17  }
  0x3d   : > { %575 = vperm.xlu0 %1235, %v545_v18  }
  0x40   : > { %716 = vperm.xlu1 %1236, %v701_v19  }
  0x41   : > { %711 = vperm.xlu0 %1235, %v700_v20  }
  0x45   : > { %721 = vperm.xlu0 %1235, %v702_v21  }
  0x9b   : > { %v502_v24 = vpop.permute.xlu1 %501 }
  0x9c   : > { %v454_v25 = vpop.permute.xlu0 %453 }
  0x9d   : > { %v487_v26 = vmul.f32 %v1072_v23, %v454_v25 }
  0x9f   : > { %v529_v27 = vadd.f32 %v502_v24, %v487_v26  ;;  %v507_v28 = vpop.permute.xlu1 %506 }
  0xa0   : > { %v459_v29 = vpop.permute.xlu0 %458 }
  0xa1   : > { %v488_v30 = vmul.f32 %v1072_v23, %v459_v29  ;;  %1237 = vtanh.f32 %v529_v27  ;;  %v697_v27 = vld [vmem:[%s438_s21] sm:$0xff]  ;;  %v699_v29 = vld [vmem:[%s438_s21 + $0x10] sm:$0xff] }
  0xa3   : > { %v530_v31 = vadd.f32 %v507_v28, %v488_v30  ;;  %v469_v32 = vpop.permute.xlu1 %468  ;;  %v698_v28 = vld [vmem:[%s438_s21 + $0x8] sm:$0xff]  ;;  %s1267_s21 = scalar_lea.vmem %s1527_s26, 384 }
  0xa4   : > { %v464_v33 = vpop.permute.xlu0 %463  ;;  %v490_v34 = vmul.f32 %v1072_v23, %v469_v32  ;;  %v1082_v32 = vld [vmem:[%s1576_s1] ss:$0 sm:$0xff]  ;;  %p1268_p12 = scmp.ne.s32.totalorder %s1527_s26, %s1267_s21  ;;  %p1275_p2 = scmp.lt.s32.totalorder %s1273_s16, %s1267_s21 }
  0xa5   : > { %1239 = vtanh.f32 %v530_v31  ;;  %v489_v35 = vmul.f32 %v1072_v23, %v464_v33 }
  0xa6   : > { %p1269_p13 = pnand %p1268_p12, %p1439_p4  ;;  %p1276_p3 = por %p1275_p2, %p1274_p1 }
  0xa7   : > { %v517_v36 = vpop.permute.xlu1 %516 }
  0xa8   : > { %v512_v37 = vpop.permute.xlu0 %511  ;;  %v532_v38 = vadd.f32 %v517_v36, %v490_v34  ;;  %p1270_p0 = pneg %p1269_p13 }
  0xa9   : > { %v531_v39 = vadd.f32 %v512_v37, %v489_v35 }
  0xaa   : > { %1241 = vtanh.f32 %v532_v38  ;;  %p1277_p5 = pnand %p1276_p3, %p1270_p0 }
  0xab   : > { %1243 = vtanh.f32 %v531_v39  ;;  %v479_v40 = vpop.permute.xlu1 %478  ;;  %v1238_v42 = vpop.eup %1237 }
  0xac   : > { %v474_v41 = vpop.permute.xlu0 %473  ;;  %v492_v44 = vmul.f32 %v1072_v23, %v479_v40 }
  0xad   : > { %v491_v45 = vmul.f32 %v1072_v23, %v474_v41 }
  0xaf   : > { %v1240_v43 = vpop.eup %1239  ;;  %v527_v46 = vpop.permute.xlu1 %526 }
  0xb0   : > { %v522_v47 = vpop.permute.xlu0 %521  ;;  %v1149_v48 = vpack.c.bf16 %v1240_v43, %v1238_v42  ;;  %v534_v49 = vadd.f32 %v527_v46, %v492_v44 }
  0xb1   : > { %v533_v50 = vadd.f32 %v522_v47, %v491_v45 }
  0xb2   : > { %1150 = vmatprep.subr.bf16.mxu0 %v1149_v48  ;;  %1245 = vtanh.f32 %v534_v49  ;;  %v840_v49 = vld [vmem:[#allocation2] sm:$0xff] }
  0xb3   : > { %1152 = vmatpush3.bf16.msra.mxu0 %v1149_v48  ;;  %1247 = vtanh.f32 %v533_v50  ;;  %v561_v0 = vpop.permute.xlu1 %560 }
  0xb4   : > { %v1242_v51 = vpop.eup %1241  ;;  %v556_v1 = vpop.permute.xlu0 %555 }
  0xb5   : > { %v1244_v52 = vpop.eup %1243 }
  0xb6   : > { %v1153_v53 = vpack.c.bf16 %v1242_v51, %v1244_v52  ;;  %v841_v52 = vld [vmem:[#allocation2 + $0x8] sm:$0xff] }
  0xb7   : > { %v571_v5 = vpop.permute.xlu1 %570 }
  0xb8   : > { %1154 = vmatprep.subr.bf16.mxu0 %v1153_v53  ;;  %v566_v7 = vpop.permute.xlu0 %565 }
  0xb9   : > { %1156 = vmatpush3.bf16.msra.mxu0 %v1153_v53 }
  0xbb   : > { %v581_v12 = vpop.permute.xlu1 %580 }
  0xbc   : > { %v1246_v54 = vpop.eup %1245  ;;  %v576_v14 = vpop.permute.xlu0 %575 }
  0xbd   : > { %v1248_v55 = vpop.eup %1247 }
  0xbe   : > { %v1157_v56 = vpack.c.bf16 %v1246_v54, %v1248_v55  ;;  %v842_v55 = vld [vmem:[#allocation2 + $0x10] sm:$0xff] }
  0xbf   : > { %v717_v36 = vpop.permute.xlu1 %716 }
  0xc0   : > { %1158 = vmatprep.subr.bf16.mxu0 %v1157_v56  ;;  %v712_v30 = vpop.permute.xlu0 %711 }
  0xc1   : > { %1160 = vmatpush3.bf16.msra.mxu0 %v1157_v56 }
  0xc4   : > { %1120 = vmatmul.mubr.msk.f32.vlgmr.msra.gmra.mrb[0].mxu0 %vm583_vm0, %v536_v57  ;;  %v722_v42 = vpop.permute.xlu0 %721 }
  0xc5   : > { %1122 = vmatprep.mubr.msk.f32.mxu0 %vm583_vm0, %v537_v58 }
  0xc8   : > { %1123 = vmatmul.mubr.msk.f32.gmra.mrb[2].mxu0 %vm583_vm0, %v538_v59 }
  0xc9   : > { %1125 = vmatprep.mubr.msk.f32.mxu0 %vm583_vm0, %v539_v60 }
  0xcc   : > { %1126 = vmatmul.mubr.msk.f32.gmra.mrb[4].mxu0 %vm583_vm0, %v540_v61 }
 0x197   : > { %v1121_v2 = vpop.f32.mrb[0].mxu0 }
 0x198   : > { %v674_v3 = vadd.f32 %v1121_v2, %v561_v0  ;;  %v668_v4 = vpop.f32.mrb[1].mxu0 }
 0x199   : > { %v669_v6 = vadd.f32 %v668_v4, %v556_v1 }
 0x19a   : > { %1249 = vtanh.f32 %v674_v3 }
 0x19b   : > { %1251 = vtanh.f32 %v669_v6  ;;  %v1124_v8 = vpop.f32.mrb[2].mxu0 }
 0x19c   : > { %v684_v9 = vadd.f32 %v1124_v8, %v571_v5  ;;  %v678_v10 = vpop.f32.mrb[3].mxu0 }
 0x19d   : > { %v679_v11 = vadd.f32 %v678_v10, %v566_v7 }
 0x19e   : > { %1253 = vtanh.f32 %v684_v9 }
 0x19f   : > { %1255 = vtanh.f32 %v679_v11  ;;  %v1127_v13 = vpop.f32.mrb[4].mxu0 }
 0x1a0   : > { %v694_v15 = vadd.f32 %v1127_v13, %v581_v12  ;;  %v688_v16 = vpop.f32.mrb[5].mxu0 }
 0x1a1   : > { %v689_v17 = vadd.f32 %v688_v16, %v576_v14 }
 0x1a2   : > { %1257 = vtanh.f32 %v694_v15 }
 0x1a3   : > { %1259 = vtanh.f32 %v689_v17 }
 0x1a4   : > { %v1250_v18 = vpop.eup %1249 }
 0x1a5   : > { %v1252_v19 = vpop.eup %1251 }
 0x1a6   : > { %v1162_v20 = vpack.c.bf16 %v1250_v18, %v1252_v19 }
 0x1a8   : > { %v1254_v21 = vpop.eup %1253  ;;  %1163 = vmatpush3.bf16.msra.mxu1 %v1162_v20 }
 0x1a9   : > { %v1256_v22 = vpop.eup %1255  ;;  %1164 = vmatprep.subr.bf16.mxu1 %v1348_v62 }
 0x1aa   : > { %v1165_v23 = vpack.c.bf16 %v1254_v21, %v1256_v22 }
 0x1ac   : > { %v1258_v24 = vpop.eup %1257  ;;  %1166 = vmatpush3.bf16.msra.mxu1 %v1165_v23 }
 0x1ad   : > { %v1260_v25 = vpop.eup %1259  ;;  %1167 = vmatprep.subr.bf16.mxu1 %v1348_v62 }
 0x1ae   : > { %v1168_v26 = vpack.c.bf16 %v1258_v24, %v1260_v25 }
 0x1b0   : > { %1169 = vmatpush3.bf16.msra.mxu1 %v1168_v26 }
 0x1b3   : > { %1141 = vmatmul.mubr.msk.f32.vlgmr.msra.gmra.mrb[0].mxu1 %vm583_vm0, %v697_v27 }
 0x1b4   : > { %1143 = vmatprep.mubr.msk.f32.mxu1 %vm1349_vm1, %v1350_v63 }
 0x1b7   : > { %1144 = vmatmul.mubr.msk.f32.gmra.mrb[2].mxu1 %vm583_vm0, %v698_v28 }
 0x1b8   : > { %1146 = vmatprep.mubr.msk.f32.mxu1 %vm1349_vm1, %v1350_v63 }
 0x1bb   : > { %1147 = vmatmul.mubr.msk.f32.gmra.mrb[4].mxu1 %vm583_vm0, %v699_v29 }
 0x286   : > { %v799_v31 = vpop.f32.mrb[0].mxu1 }
 0x287   : > { %v800_v33 = vadd.f32 %v799_v31, %v712_v30  ;;  %v1142_v34 = vpop.f32.mrb[1].mxu1 }
 0x289   : > { %v820_v35 = vmul.f32 %v1082_v32, %v800_v33 }
 0x28a   : > { %v804_v37 = vpop.f32.mrb[2].mxu1 }
 0x28b   : > { %v805_v38 = vadd.f32 %v804_v37, %v717_v36  ;;  %v1145_v39 = vpop.f32.mrb[3].mxu1  ;;  %v823_v40 = vmul.f32 %v820_v35, %v800_v33 }
 0x28d   : > { %826 = vadd.xlane.f32.xlu1 %v823_v40  ;;  %v821_v41 = vmul.f32 %v1082_v32, %v805_v38 }
 0x28e   : > { %v809_v43 = vpop.f32.mrb[4].mxu1 }
 0x28f   : > { %v810_v44 = vadd.f32 %v809_v43, %v722_v42  ;;  %v1148_v45 = vpop.f32.mrb[5].mxu1  ;;  %v824_v46 = vmul.f32 %v821_v41, %v805_v38 }
 0x291   : > { %828 = vadd.xlane.f32.xlu0 %v824_v46  ;;  %v822_v47 = vmul.f32 %v1082_v32, %v810_v44 }
 0x293   : > { %v825_v48 = vmul.f32 %v822_v47, %v810_v44 }
 0x295   : > { %830 = vadd.xlane.f32.xlu0 %v825_v48 }
 0x31a   : > { %v827_v50 = vpop.xlane.xlu1 %826 }
 0x31b   : > { %v843_v51 = vadd.f32 %v840_v49, %v827_v50 }
 0x31d   : > { %847 = vst.msk [vmem:[#allocation2] sm:$0xff] %vm836_vm2, %v843_v51 }
 0x31e   : > { %v829_v53 = vpop.xlane.xlu0 %828 }
 0x31f   : > { %v844_v54 = vadd.f32 %v841_v52, %v829_v53 }
 0x321   : > { %848 = vst.msk [vmem:[#allocation2 + $0x8] sm:$0xff] %vm836_vm2, %v844_v54 }
 0x322   : > { %v831_v56 = vpop.xlane.xlu0 %830 }
 0x323   : > { %v845_v57 = vadd.f32 %v842_v55, %v831_v56 }
 0x324   : > { %v863_v58 = vld [vmem:[#allocation2] sm:$0xff] }
 0x325   : > { %849 = vst.msk [vmem:[#allocation2 + $0x10] sm:$0xff] %vm836_vm2, %v845_v57  ;;  %1261 = vrsqrt.f32 %v863_v58 }
 0x328   : > { %v864_v59 = vld [vmem:[#allocation2 + $0x8] sm:$0xff] }
 0x329   : > { %1263 = vrsqrt.f32 %v864_v59 }
 0x32c   : > { %v865_v60 = vld [vmem:[#allocation2 + $0x10] sm:$0xff] }
 0x32d   : > { %1265 = vrsqrt.f32 %v865_v60 }
 0x32f   : > { %v1262_v61 = vpop.eup %1261 }
 0x330   : > { %871 = vperm.xlu1 %1236, %v1262_v61  }
 0x333   : > { %v1264_v62 = vpop.eup %1263 }
 0x334   : > { %876 = vperm.xlu0 %1235, %v1264_v62  }
 0x337   : > { %v1266_v63 = vpop.eup %1265 }
 0x338   : > { %881 = vperm.xlu1 %1236, %v1266_v63  }
 0x3af   : > { %v872_v0 = vpop.permute.xlu1 %871 }
 0x3b0   : > { %v884_v1 = vmul.f32 %v872_v0, %v800_v33 }
 0x3b2   : > { %887 = vst [vmem:[%s407_s24] sm:$0xff] %v884_v1 }
 0x3b3   : > { %v877_v2 = vpop.permute.xlu0 %876 }
 0x3b4   : > { %v885_v3 = vmul.f32 %v877_v2, %v805_v38 }
 0x3b6   : > { %888 = vst [vmem:[%s407_s24 + $0x8] sm:$0xff] %v885_v3 }
 0x3b7   : > { %v882_v4 = vpop.permute.xlu1 %881 }
 0x3b8   : > { %v886_v5 = vmul.f32 %v882_v4, %v810_v44 }
 0x3ba   : > { %889 = vst [vmem:[%s407_s24 + $0x10] sm:$0xff] %v886_v5 }
 0x3bb   : > { %1280 = shalt.err (!%p1277_p5)
}
 0x3bc   : > { %s1281_s22 = scalar_lea.hbm %s1525_s20, 384  ;;  %s1285_s25 = scalar_lea.hbm %s1583_s8, 768 }
 0x3bd   : > { %p1282_p6 = scmp.ne.s32.totalorder %s1525_s20, %s1281_s22  ;;  %p1286_p10 = scmp.lt.u32.totalorder %s1525_s20, %s1583_s8 }
 0x3be   : > { %p1287_p11 = scmp.lt.u32.totalorder %s1285_s25, %s1281_s22  ;;  %p1289_p13 = scmp.lt.u32.totalorder %s1281_s22, %s1525_s20 }
 0x3bf   : > { %p1283_p7 = pnand %p1282_p6, %p1439_p4 }
 0x3c0   : > { %p1288_p12 = por %p1287_p11, %p1286_p10 }
 0x3c1   : > { %p1284_p9 = pneg %p1283_p7 }
 0x3c2   : > { %p1290_p0 = por %p1289_p13, %p1288_p12 }
 0x3c4   : > { %p1291_p1 = pnand %p1290_p0, %p1284_p9 }
 0x3c6   : > { %1294 = shalt.err (!%p1291_p1)
}
 0x3c7   : > { %s1352_s21 = smov 128   ;;  %s1353_s30 = smov 8  }
 0x3c8   : > { %1174 = dma.vmem_to_hbm [thread:$0]  (%p1439_p4), %s1527_s26, 384, %s1525_s20, %s1529_s14, %s1352_s21, %s1352_s21, %s1353_s30  }
 0x3c9 PF: > { %p1180_p2 = scmp.ge.s32.totalorder %s1345_s10, 2  ;;  %s919_s19 = sand.u32 1, %s1325_s27  }
 0x3ca   : > { %s920_s16 = scalar_lea.sflag [#allocation4], %s919_s19 }
 0x3cb   : > { %p1177_p3 = pnand %p1180_p2, %p1446_p8 }
 0x3cd   : > { %1320 = dma.done.wait (!%p1177_p3), %s920_s16, 384  }
 0x3ce   : > { %1322 = vsyncadd (!%p1177_p3), %s920_s16, 4294966912  ;;  %s21_s10 = sadd.s32 1, %s1345_s10   ;;  %s1586_s27 = smov %s1329_s28 }
 0x3cf   : > { %p18_p5 = scmp.ge.s32.totalorder %s21_s10, 4   ;;  %s1587_s28 = smov %s1333_s29 }
 0x3d0   : > { %s1588_s29 = smov %s1452_s18  ;;  %s1589_s30 = smov %s1341_s9 }
 0x3d1   : > { %s1590_s9 = smov %s1592_s13  ;;  %20 = sbr.rel (!%p18_p5) target bundleno = 4 (0x4), region = 117 }
 0x3d8   :  { %925 = vsyncpa [#allocation4], 1 }
 0x3d9   :  { %927 = vsyncpa [#allocation4 + $0x1], 1 }

</bundles_post_ra>
